<compile_context>
chip_gen: v6e
topology: v6e:2x2x1
jax: 0.10.0
libtpu: 0.0.40
codegen_flags: <defaults>
</compile_context>

<pallas_src>
import functools

import jax
import jax.numpy as jnp
from jax import lax
from jax.experimental import pallas as pl
from jax.experimental.pallas import tpu as pltpu


def _pick_block_rows(n):
    """Largest convenient row-tile size that divides n (keeps full-B columns)."""
    for tm in (512, 256, 128, 64, 32, 16, 8):
        if n % tm == 0:
            return tm
    return n  # odd sizes: single full-extent tile (full dims satisfy layout rules)


def _mrl_kernel(d_row_ref, d_col_ref, score_ref, out_ref, *scratch,
                tm, margin, use_i2t, use_t2i, max_violation):
    """One row tile: rows [i*tm, (i+1)*tm) x all B columns."""
    i = pl.program_id(0)
    n_tiles = pl.num_programs(0)

    s = score_ref[...].astype(jnp.float32)              # (tm, B)
    # torch order: (margin + score) - d — one shared add for both directions.
    sm = s + jnp.float32(margin)

    partial = jnp.float32(0.0)

    eye = None
    if max_violation and (use_i2t or use_t2i):
        n = s.shape[1]
        row_g = lax.broadcasted_iota(jnp.int32, (tm, n), 0) + i * tm
        col_g = lax.broadcasted_iota(jnp.int32, (tm, n), 1)
        eye = row_g == col_g

    if use_i2t:
        # compare each score to the diagonal score of its *column* (d2).
        cost_s = jnp.maximum(sm - d_row_ref[...], 0.0)          # (tm, B)
        if max_violation:
            colmax_ref = scratch[0]                             # (1, B) running column max
            cost_s = jnp.where(eye, 0.0, cost_s)
            tile_colmax = jnp.max(cost_s, axis=0, keepdims=True)

            @pl.when(i == 0)
            def _():
                colmax_ref[...] = tile_colmax

            @pl.when(i > 0)
            def _():
                colmax_ref[...] = jnp.maximum(colmax_ref[...], tile_colmax)

            is_last = (i == n_tiles - 1).astype(jnp.float32)
            partial = partial + is_last * jnp.sum(colmax_ref[...])
        else:
            # Diagonal left unmasked here; exact correction applied in wrapper.
            partial = partial + jnp.sum(cost_s)

    if use_t2i:
        # compare each score to the diagonal score of its *row* (d1).
        cost_im = jnp.maximum(sm - d_col_ref[...], 0.0)         # (tm, B)
        if max_violation:
            cost_im = jnp.where(eye, 0.0, cost_im)
            # per-row max sees all B columns inside this tile -> tile-local.
            partial = partial + jnp.sum(jnp.max(cost_im, axis=1, keepdims=True))
        else:
            partial = partial + jnp.sum(cost_im)

    # Lane-dense, unmasked store of this tile's partial; wrapper reads [::8, 0].
    out_ref[...] = jnp.broadcast_to(partial, (8, 128))


def margin_ranking_loss_with_score(score, *, margin=0.0, max_violation=False,
                                   cost_style='sum', direction='bidir',
                                   block_rows=None):
    """Pallas TPU forward of MarginRankingLossWithScore. `score` is (B, B)."""
    n = score.shape[0]
    assert score.ndim == 2 and score.shape == (n, n), \
        "score must be a square (batch, batch) matrix"

    use_i2t = direction in ('i2t', 'bidir')
    use_t2i = direction in ('t2i', 'bidir')
    if not (use_i2t or use_t2i):
        # torch: zeros(1).sum() + zeros(1).sum() (or means) == 0
        return jnp.float32(0.0)

    tm = block_rows if block_rows is not None else _pick_block_rows(n)
    assert n % tm == 0, "block_rows must divide the batch size"
    num_tiles = n // tm

    diag = jnp.diagonal(score).astype(jnp.float32)      # (n,)
    d_row = diag.reshape(1, n)                          # diag of column j  (d2)
    d_col = diag.reshape(n, 1)                          # diag of row i     (d1)

    kernel = functools.partial(
        _mrl_kernel, tm=tm, margin=float(margin),
        use_i2t=use_i2t, use_t2i=use_t2i, max_violation=max_violation)

    if use_i2t and max_violation:
        # cross-tile running column-max -> serial grid + VMEM scratch carry
        scratch_shapes = [pltpu.VMEM((1, n), jnp.float32)]
        dim_sem = ("arbitrary",)
    else:
        scratch_shapes = []
        dim_sem = ("parallel",)

    grid_spec = pltpu.PrefetchScalarGridSpec(
        num_scalar_prefetch=0,
        grid=(num_tiles,),
        in_specs=[
            pl.BlockSpec((1, n), lambda i: (0, 0)),     # full diagonal (row form)
            pl.BlockSpec((tm, 1), lambda i: (i, 0)),    # diagonal slice for this row tile
            pl.BlockSpec((tm, n), lambda i: (i, 0)),    # (TM, B) score slab
        ],
        out_specs=pl.BlockSpec((8, 128), lambda i: (i, 0)),
        scratch_shapes=scratch_shapes,
    )

    partials = pl.pallas_call(
        kernel,
        out_shape=jax.ShapeDtypeStruct((num_tiles * 8, 128), jnp.float32),
        grid_spec=grid_spec,
        compiler_params=pltpu.CompilerParams(
            dimension_semantics=dim_sem,
            vmem_limit_bytes=64 * 1024 * 1024),
    )(d_row, d_col, score)

    total = jnp.sum(partials[::8, 0])                   # one value per row tile

    margin32 = jnp.float32(margin)
    if not max_violation:
        # Exact removal of the diagonal terms torch masks out: each diagonal
        # element contributed max((margin + s_ii) - s_ii, 0) (same f32 op order
        # as the kernel), so this correction is bit-consistent with masking.
        diag_corr = jnp.sum(jnp.maximum((diag + margin32) - diag, 0.0))
        total = total - jnp.float32(int(use_i2t) + int(use_t2i)) * diag_corr

    if cost_style == 'sum':
        return total
    denom = jnp.float32(n if max_violation else n * n)  # GLOBAL count for 'mean'
    return total / denom


def _reference(score, margin=0.0, max_violation=False, cost_style='sum',
               direction='bidir'):
    """Pure-JAX reference mirroring the PyTorch module (for sanity check)."""
    n = score.shape[0]
    score = score.astype(jnp.float32)
    diag = jnp.diag(score).reshape(n, 1)
    d1 = jnp.broadcast_to(diag, (n, n))
    d2 = jnp.broadcast_to(diag.T, (n, n))
    I = jnp.eye(n, dtype=bool)
    total = jnp.float32(0.0)
    if direction in ('i2t', 'bidir'):
        cost_s = jnp.where(I, 0.0, jnp.maximum(margin + score - d2, 0.0))
        if max_violation:
            cost_s = jnp.max(cost_s, axis=0)
        total = total + (jnp.sum(cost_s) if cost_style == 'sum' else jnp.mean(cost_s))
    if direction in ('t2i', 'bidir'):
        cost_im = jnp.where(I, 0.0, jnp.maximum(margin + score - d1, 0.0))
        if max_violation:
            cost_im = jnp.max(cost_im, axis=1)
        total = total + (jnp.sum(cost_im) if cost_style == 'sum' else jnp.mean(cost_im))
    return total


if __name__ == "__main__":
    key = jax.random.PRNGKey(0)
    k_small, k_big = jax.random.split(key)

    # Module defaults: margin=0, max_violation=False, cost_style='sum', direction='bidir'
    B = 8
    score = jax.random.normal(k_small, (B, B), dtype=jnp.float32)
    loss = jax.block_until_ready(margin_ranking_loss_with_score(score))
    ref = _reference(score)
    assert jnp.allclose(loss, ref, atol=1e-5, rtol=1e-5), (loss, ref)

    # Multi-tile checks (4 row tiles of 8) across configurations, including the
    # cross-tile column-max path and 'mean' with global counts.
    B2 = 32
    score2 = jax.random.normal(k_big, (B2, B2), dtype=jnp.float32)
    configs = [
        dict(margin=0.2, max_violation=False, cost_style='sum', direction='bidir'),
        dict(margin=0.2, max_violation=True, cost_style='mean', direction='bidir'),
        dict(margin=0.1, max_violation=True, cost_style='sum', direction='i2t'),
        dict(margin=0.3, max_violation=False, cost_style='mean', direction='t2i'),
    ]
    for cfg in configs:
        got = jax.block_until_ready(
            margin_ranking_loss_with_score(score2, block_rows=8, **cfg))
        want = _reference(score2, **cfg)
        assert jnp.allclose(got, want, atol=1e-5, rtol=1e-5), (cfg, got, want)

    print("KERNEL_OK")
</pallas_src>

<mosaic_0001>
module attributes {stable_mosaic.version = 11 : i64} {
  func.func @_mrl_kernel(%arg0: i32, %arg1: memref<1x8xf32, #tpu.memory_space<vmem>>, %arg2: memref<8x1xf32, #tpu.memory_space<vmem>>, %arg3: memref<8x8xf32, #tpu.memory_space<vmem>>, %arg4: memref<8x128xf32, #tpu.memory_space<vmem>>) attributes {dimension_semantics = [#tpu.dimension_semantics<parallel>], iteration_bounds = array<i64: 1>, scalar_prefetch = 0 : i64, scratch_operands = 0 : i64, tpu.core_type = #tpu.core_type<tc>, window_params = [{pipeline_mode = #tpu.pipeline_mode<synchronous>, transform_indices = @transform_0, window_bounds = array<i64: 1, 8>}, {transform_indices = @transform_1, window_bounds = array<i64: 8, 1>}, {transform_indices = @transform_2, window_bounds = array<i64: 8, 8>}, {transform_indices = @transform_3, window_bounds = array<i64: 8, 128>}]} {
    %c0 = arith.constant 0 : index
    %c0_0 = arith.constant 0 : index
    %0 = vector.load %arg3[%c0, %c0_0] : memref<8x8xf32, #tpu.memory_space<vmem>>, vector<8x8xf32>
    %cst = arith.constant 0.000000e+00 : f32
    %1 = vector.broadcast %cst : f32 to vector<8x8xf32>
    %2 = arith.addf %0, %1 : vector<8x8xf32>
    %c0_1 = arith.constant 0 : index
    %c0_2 = arith.constant 0 : index
    %3 = vector.load %arg1[%c0_1, %c0_2] : memref<1x8xf32, #tpu.memory_space<vmem>>, vector<1x8xf32>
    %4 = vector.broadcast %3 : vector<1x8xf32> to vector<8x8xf32>
    %5 = arith.subf %2, %4 : vector<8x8xf32>
    %cst_3 = arith.constant 0.000000e+00 : f32
    %6 = vector.broadcast %cst_3 : f32 to vector<8x8xf32>
    %7 = arith.maximumf %5, %6 : vector<8x8xf32>
    %8 = vector.shape_cast %7 : vector<8x8xf32> to vector<1x8x8xf32>
    %cst_4 = arith.constant dense<0.000000e+00> : vector<1xf32>
    %9 = vector.multi_reduction <add>, %8, %cst_4 [1, 2] : vector<1x8x8xf32> to vector<1xf32>
    %10 = vector.shape_cast %9 : vector<1xf32> to vector<1x1x1xf32>
    %11 = vector.extract %10[0, 0, 0] : f32 from vector<1x1x1xf32>
    %cst_5 = arith.constant 0.000000e+00 : f32
    %12 = arith.addf %cst_5, %11 : f32
    %c0_6 = arith.constant 0 : index
    %c0_7 = arith.constant 0 : index
    %13 = vector.load %arg2[%c0_6, %c0_7] : memref<8x1xf32, #tpu.memory_space<vmem>>, vector<8x1xf32>
    %14 = vector.broadcast %13 : vector<8x1xf32> to vector<8x8xf32>
    %15 = arith.subf %2, %14 : vector<8x8xf32>
    %cst_8 = arith.constant 0.000000e+00 : f32
    %16 = vector.broadcast %cst_8 : f32 to vector<8x8xf32>
    %17 = arith.maximumf %15, %16 : vector<8x8xf32>
    %18 = vector.shape_cast %17 : vector<8x8xf32> to vector<1x8x8xf32>
    %cst_9 = arith.constant dense<0.000000e+00> : vector<1xf32>
    %19 = vector.multi_reduction <add>, %18, %cst_9 [1, 2] : vector<1x8x8xf32> to vector<1xf32>
    %20 = vector.shape_cast %19 : vector<1xf32> to vector<1x1x1xf32>
    %21 = vector.extract %20[0, 0, 0] : f32 from vector<1x1x1xf32>
    %22 = arith.addf %12, %21 : f32
    %23 = vector.broadcast %22 : f32 to vector<8x128xf32>
    %c0_10 = arith.constant 0 : index
    %c0_11 = arith.constant 0 : index
    %24 = vector.load %arg4[%c0_10, %c0_11] : memref<8x128xf32, #tpu.memory_space<vmem>>, vector<8x128xf32>
    tpu.vector_store %arg4[%c0_10, %c0_11], %23 {strides = array<i32>} : memref<8x128xf32, #tpu.memory_space<vmem>>, vector<8x128xf32>,
    return
  }
  func.func @transform_0(%arg0: i32) -> (i32, i32) {
    %c0_i32 = arith.constant 0 : i32
    %c0_i32_0 = arith.constant 0 : i32
    %c0_i32_1 = arith.constant 0 : i32
    return %c0_i32, %c0_i32_0 : i32, i32
  }
  func.func @transform_1(%arg0: i32) -> (i32, i32) {
    %c0_i32 = arith.constant 0 : i32
    %c0_i32_0 = arith.constant 0 : i32
    return %arg0, %c0_i32 : i32, i32
  }
  func.func @transform_2(%arg0: i32) -> (i32, i32) {
    %c0_i32 = arith.constant 0 : i32
    %c0_i32_0 = arith.constant 0 : i32
    return %arg0, %c0_i32 : i32, i32
  }
  func.func @transform_3(%arg0: i32) -> (i32, i32) {
    %c0_i32 = arith.constant 0 : i32
    %c0_i32_0 = arith.constant 0 : i32
    return %arg0, %c0_i32 : i32, i32
  }
}

</mosaic_0001>

<bundles_post_ra>
// kernel: tpu_custom_call.1
= control target key start
LH: loop header
LB: loop body
LE: loop exit
PB: predicated region body
PF: predicated region fallthrough
CT: control target
= control target key end

     0   :  { %v103_v1 = vmov 0   ;;  %s137_s0 = inlined_call_operand.vmem [shape: f32[1,8], index: 0, kind: input, shape index: {}]   ;;  %s138_s1 = inlined_call_operand.vmem [shape: f32[8,1], index: 1, kind: input, shape index: {}]   ;;  %s139_s2 = inlined_call_operand.vmem [shape: f32[8,8], index: 2, kind: input, shape index: {}]   ;;  %s140_s3 = inlined_call_operand.hbm [shape: f32[8,128], index: 3, kind: output, shape index: {}]  }
   0x1   :  { %v38_v0 = vld [vmem:[%s138_s1] sm:$0xff]  ;;  %80 = vset.pattern.permute.xlu0 %v103_v1 }
   0x2   :  { %8 = vsyncpa [#allocation3], 0  ;;  %41 = vperm.xlu0 %80, %v38_v0   ;;  %v15_v2 = vld [vmem:[%s139_s2] sm:$0xff]  ;;  %vm26_vm0 = vcmask 64512   ;;  %s104_s1 = smov [#allocation2]  }
   0x3   :  { %v73_v3 = vld [vmem:[%s137_s0] ss:$0 sm:$0xff]  ;;  %s65_s2 = sshll.u32 %s104_s1, 4  ;;  %s66_s2 = int_to_ptr.vmem [resolvable:$true] %s65_s2 }
   0x4   :  { %v24_v4 = vsub.f32 %v15_v2, %v73_v3  ;;  %s81_s20 = scalar_lea.vmem %s66_s2, 128  ;;  %p86_p1 = scmp.lt.s32.totalorder %s66_s2, %s66_s2 }
   0x5   :  { %p82_p0 = scmp.ne.s32.totalorder %s66_s2, %s81_s20  ;;  %p87_p2 = scmp.lt.s32.totalorder %s81_s20, %s81_s20 }
   0x6   :  { %v25_v5 = vmax.f32 %v24_v4, 0.0 }
   0x7   :  { %p88_p3 = por %p87_p2, %p86_p1 }
   0x8   :  { %v27_v6 = vsel %vm26_vm0, %v25_v5, 0.0 }
   0x9   :  { %p89_p4 = pnand %p88_p3, %p82_p0 }
  0x21   :  { %28 = vadd.xlane.f32.xlu0 %v27_v6 }
  0x7d   :  { %v42_v7 = vpop.permute.xlu0 %41 }
  0x7e   :  { %v44_v8 = vsub.f32 %v15_v2, %v42_v7 }
  0x80   :  { %v45_v9 = vmax.f32 %v44_v8, 0.0 }
  0x82   :  { %v46_v10 = vsel %vm26_vm0, %v45_v9, 0.0 }
  0x83   :  { %47 = vadd.xlane.f32.xlu1 %v46_v10 }
  0xaa   :  { %v29_v11 = vpop.xlane.xlu0 %28 }
  0xab   :  { %v30_v12 = vrot.slane %v29_v11, 4 }
  0xad   :  { %v31_v13 = vadd.f32 %v30_v12, %v29_v11 }
  0xaf   :  { %v32_v14 = vrot.slane %v31_v13, 2 }
  0xb1   :  { %v33_v15 = vadd.f32 %v32_v14, %v31_v13 }
  0xb3   :  { %v34_v16 = vrot.slane %v33_v15, 1 }
  0xb5   :  { %v35_v17 = vadd.f32 %v34_v16, %v33_v15 }
  0xb7   :  { %74 = vpush %v35_v17 }
  0xe8   :  { %s75_s0 = spop %74 }
 0x10c   :  { %v48_v18 = vpop.xlane.xlu1 %47 }
 0x10d   :  { %v49_v19 = vrot.slane %v48_v18, 4 }
 0x10f   :  { %v50_v20 = vadd.f32 %v49_v19, %v48_v18 }
 0x111   :  { %v51_v21 = vrot.slane %v50_v20, 2 }
 0x113   :  { %v52_v22 = vadd.f32 %v51_v21, %v50_v20 }
 0x115   :  { %v53_v23 = vrot.slane %v52_v22, 1 }
 0x117   :  { %v54_v24 = vadd.f32 %v53_v23, %v52_v22 }
 0x119   :  { %76 = vpush %v54_v24 }
 0x14a   :  { %s77_s18 = spop %76 }
 0x14b   :  { %s56_s19 = sadd.f32 %s77_s18, %s75_s0 }
 0x14d   :  { %v57_v25 = vstv %s56_s19 }
 0x14e   :  { %58 = vst [vmem:[#allocation2] sm:$0xff] %v57_v25 }
 0x14f   :  { %92 = shalt.err (!%p89_p4)
}
 0x150   :  { %68 = dma.vmem_to_hbm [thread:$0]  %s66_s2, 128, %s140_s3, [#allocation3]  }
 0x151   :  { %101 = dma.done.wait [#allocation3], 128  }
 0x152   :  { %102 = vsyncadd [#allocation3], 4294967168 }
 0x153   :  { %72 = vsyncpa [#allocation3], 1 }

</bundles_post_ra>
